<compile_context>
chip_gen: v7x
topology: tpu7x:2x2x1
jax: 0.10.0
libtpu: 0.0.40
codegen_flags: <defaults>
</compile_context>

<pallas_src>
import functools

import jax
import jax.numpy as jnp
from jax.experimental import pallas as pl
from jax.experimental.pallas import tpu as pltpu

BN_EPS = 1e-5   # nn.BatchNorm2d default


def _round_up(x, m):
    return ((x + m - 1) // m) * m


def _pick_t_blk(T, V, pad, target_lanes):
    """Largest time tile t_blk that divides T, keeps t_blk*V <= target_lanes, is
    lane-dense (t_blk*V % 128 == 0) and can hold the halo; falls back to whole T."""
    hv = pad * V
    hpad = _round_up(hv, 128) if pad > 0 else 0
    if T * V <= max(target_lanes, 2 * hpad):
        return T
    for cand in range(T - 1, 0, -1):
        if T % cand:
            continue
        cv = cand * V
        if cv > target_lanes:
            continue
        if cv % 128 != 0 or cv < max(hpad, 1):
            continue
        return cand
    return T            # no suitable divisor (e.g. V=25 odd sizes) -> single time tile


def _tcn_kernel(x_hbm, w_ref, shift_ref, o_ref, x_raw, x_bf, dma_sems, *,
                K, V, C_in, t_blk, hpad, fuse_k):
    # x_hbm:     (N, C_in, T*V)  full array, left in HBM (manual halo'd DMA)
    # w_ref:     fused:  (co_blk, K*C_in) bf16    (BN scale folded in)
    #            K-accum:(K, co_blk, C_in) bf16
    # shift_ref: (co_blk, 1) f32   fused BN beta + (bias - mean)*scale
    # o_ref:     (1, co_blk, t_blk*V)  activation dtype, lane-dense
    # x_raw/x_bf:(C_in, 2*hpad + t_blk*V) VMEM scratch (raw dtype / bf16)
    pad = (K - 1) // 2
    tv = t_blk * V
    hv = pad * V
    n = pl.program_id(0)
    t = pl.program_id(1)
    n_t = pl.num_programs(1)

    # ---- fetch the halo'd x window once per (n, t); reused for every C_out tile ----
    @pl.when(pl.program_id(2) == 0)
    def _load_x():
        src_start = t * tv
        if tv % 128 == 0:
            src_start = pl.multiple_of(src_start, 128)
        core = pltpu.make_async_copy(
            x_hbm.at[n, :, pl.ds(src_start, tv)],
            x_raw.at[:, pl.ds(hpad, tv)],
            dma_sems.at[0])
        core.start()
        if pad > 0:
            @pl.when(t == 0)
            def _zero_left():            # left temporal zero padding
                x_raw[:, hpad - hv:hpad] = jnp.zeros((C_in, hv), x_raw.dtype)

            @pl.when(t > 0)
            def _fetch_left():           # left halo from the previous time tile
                lh = pltpu.make_async_copy(
                    x_hbm.at[n, :, pl.ds(t * tv - hpad, hpad)],
                    x_raw.at[:, pl.ds(0, hpad)],
                    dma_sems.at[1])
                lh.start()
                lh.wait()

            @pl.when(t == n_t - 1)
            def _zero_right():           # right temporal zero padding
                x_raw[:, hpad + tv:hpad + tv + hv] = \
                    jnp.zeros((C_in, hv), x_raw.dtype)

            @pl.when(t < n_t - 1)
            def _fetch_right():          # right halo from the next time tile
                rh = pltpu.make_async_copy(
                    x_hbm.at[n, :, pl.ds((t + 1) * tv, hpad)],
                    x_raw.at[:, pl.ds(hpad + tv, hpad)],
                    dma_sems.at[2])
                rh.start()
                rh.wait()
        core.wait()
        x_bf[...] = x_raw[...].astype(x_bf.dtype)   # in-kernel bf16 cast (no HBM pass)

    # ---- temporal conv (+ folded BN) ----
    base = hpad - hv                     # lane offset of the first (padded) time step
    co_blk = o_ref.shape[1]
    if fuse_k:
        # Small C_in: single fused matmul with a K*C_in contraction (keeps MXU fed).
        rhs = jnp.concatenate(
            [x_bf[:, base + k * V: base + k * V + tv] for k in range(K)], axis=0)
        acc = jnp.dot(w_ref[...], rhs, preferred_element_type=jnp.float32)
    else:
        # Large C_in: K accumulating matmuls straight from the window (no im2col copy).
        acc = jnp.zeros((co_blk, tv), jnp.float32)
        for k in range(K):
            acc = acc + jnp.dot(
                w_ref[k], x_bf[:, base + k * V: base + k * V + tv],
                preferred_element_type=jnp.float32)
    o_ref[0] = (acc + shift_ref[...]).astype(o_ref.dtype)


def unit_tcn_forward(x, weight, bias, gamma, beta, run_mean, run_var,
                     *, kernel_size=9, stride=1, out_dtype=None,
                     time_block_lanes=4096):
    """Forward of unit_tcn (eval-mode BN, no ReLU in forward).

    x:      (N, C_in, T, V)
    weight: (C_out, C_in, K)   (PyTorch Conv2d weight (C_out, C_in, K, 1) squeezed)
    bias, gamma, beta, run_mean, run_var: (C_out,)
    """
    N, C_in, T, V = x.shape
    C_out = weight.shape[0]
    K = kernel_size
    assert K % 2 == 1, "unit_tcn uses 'same' temporal padding (odd kernel_size)"
    pad = (K - 1) // 2
    out_dtype = x.dtype if out_dtype is None else out_dtype

    # ---- fold eval-mode BN + conv bias into the weight & one per-channel shift ----
    scale = (gamma * jax.lax.rsqrt(run_var + BN_EPS)).astype(jnp.float32)     # (C_out,)
    shift_col = (beta + (bias - run_mean) * scale).astype(jnp.float32).reshape(C_out, 1)

    fuse_k = C_in < 128          # small contraction -> keep fused im2col matmul
    if fuse_k:
        # (C_out, C_in, K) -> (C_out, K, C_in) -> (C_out, K*C_in), scaled, bf16
        w_mat = (jnp.transpose(weight, (0, 2, 1)).reshape(C_out, K * C_in)
                 * scale[:, None]).astype(jnp.bfloat16)
    else:
        # (C_out, C_in, K) -> (K, C_out, C_in), scaled, bf16
        w_mat = (jnp.transpose(weight, (2, 0, 1))
                 * scale[None, :, None]).astype(jnp.bfloat16)

    # ---- tiling ----
    if C_out % 256 == 0:
        co_blk = 256        # v6e/v7x MXU is 256 wide (on v5e 128 already saturates)
    elif C_out % 128 == 0:
        co_blk = 128
    else:
        co_blk = C_out
    n_co = C_out // co_blk

    t_blk = _pick_t_blk(T, V, pad, time_block_lanes)
    n_t = T // t_blk
    tv = t_blk * V
    hv = pad * V
    hpad = _round_up(hv, 128) if pad > 0 else 0   # 128-aligned halo region in scratch
    wbuf = 2 * hpad + tv                          # scratch window width (lanes)

    # x stays unpadded & in its own dtype; only a free reshape to the flat layout.
    x_flat = x.reshape(N, C_in, T * V)

    kernel = functools.partial(_tcn_kernel, K=K, V=V, C_in=C_in, t_blk=t_blk,
                               hpad=hpad, fuse_k=fuse_k)

    if fuse_k:
        w_spec = pl.BlockSpec((co_blk, K * C_in), lambda n_, t_, co: (co, 0))
    else:
        w_spec = pl.BlockSpec((K, co_blk, C_in), lambda n_, t_, co: (0, co, 0))

    # ---- VMEM budget (scratch + double-buffered blocks + accumulator) ----
    x_bytes = jnp.dtype(x.dtype).itemsize
    o_bytes = jnp.dtype(out_dtype).itemsize
    est = (C_in * wbuf * (x_bytes + 2)            # x_raw + x_bf scratch
           + 2 * co_blk * K * C_in * 2            # weight block (double-buffered)
           + 2 * co_blk * 128 * 4                 # shift block (lane-padded)
           + 2 * co_blk * tv * o_bytes            # output block (double-buffered)
           + co_blk * tv * 4)                     # f32 accumulator
    if fuse_k:
        est += K * C_in * tv * 2                  # fused-path im2col temporary
    vmem_limit = int(min(64 * 1024 * 1024, max(2 * est + (4 << 20), 32 << 20)))

    out_flat = pl.pallas_call(
        kernel,
        out_shape=jax.ShapeDtypeStruct((N, C_out, T * V), out_dtype),
        grid_spec=pltpu.PrefetchScalarGridSpec(
            num_scalar_prefetch=0,
            # co innermost: the x window scratch is fetched once per (n, t) and reused
            # across all C_out tiles (only the small weight tile is re-streamed).
            grid=(N, n_t, n_co),
            in_specs=[
                pl.BlockSpec(memory_space=pl.ANY),     # x: stays in HBM, manual DMA
                w_spec,
                pl.BlockSpec((co_blk, 1), lambda n_, t_, co: (co, 0)),
            ],
            out_specs=pl.BlockSpec((1, co_blk, tv), lambda n_, t_, co: (n_, co, t_)),
            scratch_shapes=[
                pltpu.VMEM((C_in, wbuf), x.dtype),       # raw halo'd window
                pltpu.VMEM((C_in, wbuf), jnp.bfloat16),  # bf16 matmul operand
                pltpu.SemaphoreType.DMA((3,)),           # core / left / right copies
            ],
        ),
        compiler_params=pltpu.CompilerParams(
            dimension_semantics=("parallel", "parallel", "arbitrary"),
            vmem_limit_bytes=vmem_limit),
    )(x_flat, w_mat, shift_col)

    out = out_flat.reshape(N, C_out, T, V)
    if stride > 1:
        # stride-s conv output == stride-1 output sampled every s steps (same padding).
        out = out[:, :, ::stride, :]
    return out


def _reference(x, weight, bias, gamma, beta, run_mean, run_var,
               *, kernel_size=9, stride=1):
    """Pure-JAX f32 reference matching the PyTorch forward (eval-mode BN, no ReLU)."""
    K = kernel_size
    pad = (K - 1) // 2
    y = jax.lax.conv_general_dilated(
        x, weight[..., None],                        # OIHW with W-kernel = 1
        window_strides=(stride, 1),
        padding=((pad, pad), (0, 0)),
        dimension_numbers=("NCHW", "OIHW", "NCHW"),
        precision=jax.lax.Precision.HIGHEST,
    ) + bias.reshape(1, -1, 1, 1)
    inv = jax.lax.rsqrt(run_var.reshape(1, -1, 1, 1) + BN_EPS)
    return (gamma.reshape(1, -1, 1, 1) * (y - run_mean.reshape(1, -1, 1, 1)) * inv
            + beta.reshape(1, -1, 1, 1))


def _make_inputs(key, N, C_in, C_out, T, V, K, w_scale):
    ks = jax.random.split(key, 7)
    x = jax.random.normal(ks[0], (N, C_in, T, V), jnp.float32)
    weight = w_scale * jax.random.normal(ks[1], (C_out, C_in, K), jnp.float32)
    bias = 0.1 * jax.random.normal(ks[2], (C_out,), jnp.float32)
    gamma = 1.0 + 0.1 * jax.random.normal(ks[3], (C_out,), jnp.float32)
    beta = 0.05 * jax.random.normal(ks[4], (C_out,), jnp.float32)
    run_mean = 0.1 * jax.random.normal(ks[5], (C_out,), jnp.float32)
    run_var = 0.5 + 0.5 * jnp.abs(jax.random.normal(ks[6], (C_out,), jnp.float32))
    return x, weight, bias, gamma, beta, run_mean, run_var


if __name__ == "__main__":
    key = jax.random.PRNGKey(0)
    k1, k2 = jax.random.split(key)
    K = 9

    # Case 1: small shapes, fused-im2col path (C_in < 128), single time tile;
    #         checks both stride=1 (module default) and stride=2 (decimation path).
    args1 = _make_inputs(k1, 2, 32, 64, 16, 16, K, 0.1)
    for stride in (1, 2):
        out = unit_tcn_forward(*args1, kernel_size=K, stride=stride)
        out = jax.block_until_ready(out)
        ref = _reference(*args1, kernel_size=K, stride=stride)
        assert out.shape == ref.shape, (out.shape, ref.shape)
        assert jnp.allclose(out, ref, atol=5e-2, rtol=5e-2), \
            float(jnp.max(jnp.abs(out - ref)))

    # Case 2: K-accumulating-matmul path (C_in >= 128), two time tiles (exercises the
    #         halo DMAs + edge zero-fill) and a tiled C_out (co_blk = 256, n_co > 1? ->
    #         here n_co = 1 with co_blk = 256; co gating still exercised).
    args2 = _make_inputs(k2, 2, 128, 256, 64, 16, K, 0.05)
    out2 = unit_tcn_forward(*args2, kernel_size=K, stride=1, time_block_lanes=512)
    out2 = jax.block_until_ready(out2)
    ref2 = _reference(*args2, kernel_size=K, stride=1)
    assert out2.shape == ref2.shape, (out2.shape, ref2.shape)
    assert jnp.allclose(out2, ref2, atol=5e-2, rtol=5e-2), \
        float(jnp.max(jnp.abs(out2 - ref2)))

    print("KERNEL_OK")
</pallas_src>

<mosaic_0001>
module attributes {stable_mosaic.version = 11 : i64} {
  func.func @_tcn_kernel(%arg0: i32, %arg1: i32, %arg2: i32, %arg3: memref<2x32x256xf32, #tpu.memory_space<any>>, %arg4: memref<64x288xbf16, #tpu.memory_space<vmem>>, %arg5: memref<64x1xf32, #tpu.memory_space<vmem>>, %arg6: memref<1x64x256xf32, #tpu.memory_space<vmem>>, %arg7: memref<32x512xf32, #tpu.memory_space<vmem>>, %arg8: memref<32x512xbf16, #tpu.memory_space<vmem>>, %arg9: memref<3x!tpu.dma_semaphore, #tpu.memory_space<semaphore_mem>>) attributes {dimension_semantics = [#tpu.dimension_semantics<parallel>, #tpu.dimension_semantics<parallel>, #tpu.dimension_semantics<arbitrary>], iteration_bounds = array<i64: 2, 1, 1>, scalar_prefetch = 0 : i64, scratch_operands = 3 : i64, tpu.core_type = #tpu.core_type<tc>, window_params = [{}, {transform_indices = @transform_1, window_bounds = array<i64: 64, 288>}, {transform_indices = @transform_2, window_bounds = array<i64: 64, 1>}, {transform_indices = @transform_3, window_bounds = array<i64: 1, 64, 256>}]} {
    %c0_i32 = arith.constant 0 : i32
    %0 = arith.cmpi eq, %arg2, %c0_i32 : i32
    %1 = arith.extui %0 : i1 to i32
    %c0_i32_0 = arith.constant 0 : i32
    %2 = arith.cmpi ne, %1, %c0_i32_0 : i32
    scf.if %2 {
      %c256_i32 = arith.constant 256 : i32
      %21 = arith.muli %arg1, %c256_i32 : i32
      %22 = tpu.assume_multiple %21, 128 : i32
      %c0_i32_16 = arith.constant 0 : i32
      %c0_i32_17 = arith.constant 0 : i32
      %23 = tpu.memref_slice %arg3[%arg0, %c0_i32_17, %22] : memref<2x32x256xf32, #tpu.memory_space<any>> -> memref<1x32x256xf32, #tpu.memory_space<any>>
      %24 = tpu.memref_squeeze %23 : memref<1x32x256xf32, #tpu.memory_space<any>> -> memref<32x256xf32, #tpu.memory_space<any>>
      %c0_i32_18 = arith.constant 0 : i32
      %c128_i32 = arith.constant 128 : i32
      %25 = tpu.memref_slice %arg7[%c0_i32_18, %c128_i32] : memref<32x512xf32, #tpu.memory_space<vmem>> -> memref<32x256xf32, #tpu.memory_space<vmem>>
      %26 = tpu.memref_slice %arg9[%c0_i32_16] : memref<3x!tpu.dma_semaphore, #tpu.memory_space<semaphore_mem>> -> memref<1x!tpu.dma_semaphore, #tpu.memory_space<semaphore_mem>>
      %27 = tpu.memref_squeeze %26 : memref<1x!tpu.dma_semaphore, #tpu.memory_space<semaphore_mem>> -> memref<!tpu.dma_semaphore, #tpu.memory_space<semaphore_mem>>
      tpu.enqueue_dma source(%24 : memref<32x256xf32, #tpu.memory_space<any>>) target(%25 : memref<32x256xf32, #tpu.memory_space<vmem>>) target_semaphore(%27 : memref<!tpu.dma_semaphore, #tpu.memory_space<semaphore_mem>>)
      %c0_i32_19 = arith.constant 0 : i32
      %28 = arith.cmpi eq, %arg1, %c0_i32_19 : i32
      %29 = arith.extui %28 : i1 to i32
      %c0_i32_20 = arith.constant 0 : i32
      %30 = arith.cmpi ne, %29, %c0_i32_20 : i32
      scf.if %30 {
        %cst_35 = arith.constant 0.000000e+00 : f32
        %48 = vector.broadcast %cst_35 : f32 to vector<32x64xf32>
        %c0_36 = arith.constant 0 : index
        %c64_37 = arith.constant 64 : index
        %49 = vector.load %arg7[%c0_36, %c64_37] : memref<32x512xf32, #tpu.memory_space<vmem>>, vector<32x64xf32>
        tpu.vector_store %arg7[%c0_36, %c64_37], %48 {strides = array<i32>} : memref<32x512xf32, #tpu.memory_space<vmem>>, vector<32x64xf32>,
      } else {
      }
      %c0_i32_21 = arith.constant 0 : i32
      %31 = arith.cmpi sgt, %arg1, %c0_i32_21 : i32
      %32 = arith.extui %31 : i1 to i32
      %c0_i32_22 = arith.constant 0 : i32
      %33 = arith.cmpi ne, %32, %c0_i32_22 : i32
      scf.if %33 {
        %c256_i32_35 = arith.constant 256 : i32
        %48 = arith.muli %arg1, %c256_i32_35 : i32
        %c128_i32_36 = arith.constant 128 : i32
        %49 = arith.subi %48, %c128_i32_36 : i32
        %c1_i32 = arith.constant 1 : i32
        %c0_i32_37 = arith.constant 0 : i32
        %50 = tpu.memref_slice %arg3[%arg0, %c0_i32_37, %49] : memref<2x32x256xf32, #tpu.memory_space<any>> -> memref<1x32x128xf32, #tpu.memory_space<any>>
        %51 = tpu.memref_squeeze %50 : memref<1x32x128xf32, #tpu.memory_space<any>> -> memref<32x128xf32, #tpu.memory_space<any>>
        %c0_i32_38 = arith.constant 0 : i32
        %c0_i32_39 = arith.constant 0 : i32
        %52 = tpu.memref_slice %arg7[%c0_i32_38, %c0_i32_39] : memref<32x512xf32, #tpu.memory_space<vmem>> -> memref<32x128xf32, #tpu.memory_space<vmem>>
        %53 = tpu.memref_slice %arg9[%c1_i32] : memref<3x!tpu.dma_semaphore, #tpu.memory_space<semaphore_mem>> -> memref<1x!tpu.dma_semaphore, #tpu.memory_space<semaphore_mem>>
        %54 = tpu.memref_squeeze %53 : memref<1x!tpu.dma_semaphore, #tpu.memory_space<semaphore_mem>> -> memref<!tpu.dma_semaphore, #tpu.memory_space<semaphore_mem>>
        tpu.enqueue_dma source(%51 : memref<32x128xf32, #tpu.memory_space<any>>) target(%52 : memref<32x128xf32, #tpu.memory_space<vmem>>) target_semaphore(%54 : memref<!tpu.dma_semaphore, #tpu.memory_space<semaphore_mem>>)
        %c1_i32_40 = arith.constant 1 : i32
        %c0_i32_41 = arith.constant 0 : i32
        %55 = tpu.memref_slice %arg3[%arg0, %c0_i32_41, %49] : memref<2x32x256xf32, #tpu.memory_space<any>> -> memref<1x32x128xf32, #tpu.memory_space<any>>
        %56 = tpu.memref_squeeze %55 : memref<1x32x128xf32, #tpu.memory_space<any>> -> memref<32x128xf32, #tpu.memory_space<any>>
        %c0_i32_42 = arith.constant 0 : i32
        %c0_i32_43 = arith.constant 0 : i32
        %57 = tpu.memref_slice %arg7[%c0_i32_42, %c0_i32_43] : memref<32x512xf32, #tpu.memory_space<vmem>> -> memref<32x128xf32, #tpu.memory_space<vmem>>
        %58 = tpu.memref_slice %arg9[%c1_i32_40] : memref<3x!tpu.dma_semaphore, #tpu.memory_space<semaphore_mem>> -> memref<1x!tpu.dma_semaphore, #tpu.memory_space<semaphore_mem>>
        %59 = tpu.memref_squeeze %58 : memref<1x!tpu.dma_semaphore, #tpu.memory_space<semaphore_mem>> -> memref<!tpu.dma_semaphore, #tpu.memory_space<semaphore_mem>>
        tpu.wait_dma2 semaphore(%59 : memref<!tpu.dma_semaphore, #tpu.memory_space<semaphore_mem>>) src(%56 : memref<32x128xf32, #tpu.memory_space<any>>) dst(%57 : memref<32x128xf32, #tpu.memory_space<vmem>>)
      } else {
      }
      %c0_i32_23 = arith.constant 0 : i32
      %34 = arith.cmpi eq, %arg1, %c0_i32_23 : i32
      %35 = arith.extui %34 : i1 to i32
      %c0_i32_24 = arith.constant 0 : i32
      %36 = arith.cmpi ne, %35, %c0_i32_24 : i32
      scf.if %36 {
        %cst_35 = arith.constant 0.000000e+00 : f32
        %48 = vector.broadcast %cst_35 : f32 to vector<32x64xf32>
        %c0_36 = arith.constant 0 : index
        %c384 = arith.constant 384 : index
        %49 = vector.load %arg7[%c0_36, %c384] : memref<32x512xf32, #tpu.memory_space<vmem>>, vector<32x64xf32>
        tpu.vector_store %arg7[%c0_36, %c384], %48 {strides = array<i32>} : memref<32x512xf32, #tpu.memory_space<vmem>>, vector<32x64xf32>,
      } else {
      }
      %c0_i32_25 = arith.constant 0 : i32
      %37 = arith.cmpi slt, %arg1, %c0_i32_25 : i32
      %38 = arith.extui %37 : i1 to i32
      %c0_i32_26 = arith.constant 0 : i32
      %39 = arith.cmpi ne, %38, %c0_i32_26 : i32
      scf.if %39 {
        %c1_i32 = arith.constant 1 : i32
        %48 = arith.addi %arg1, %c1_i32 : i32
        %c256_i32_35 = arith.constant 256 : i32
        %49 = arith.muli %48, %c256_i32_35 : i32
        %c2_i32 = arith.constant 2 : i32
        %c0_i32_36 = arith.constant 0 : i32
        %50 = tpu.memref_slice %arg3[%arg0, %c0_i32_36, %49] : memref<2x32x256xf32, #tpu.memory_space<any>> -> memref<1x32x128xf32, #tpu.memory_space<any>>
        %51 = tpu.memref_squeeze %50 : memref<1x32x128xf32, #tpu.memory_space<any>> -> memref<32x128xf32, #tpu.memory_space<any>>
        %c0_i32_37 = arith.constant 0 : i32
        %c384_i32 = arith.constant 384 : i32
        %52 = tpu.memref_slice %arg7[%c0_i32_37, %c384_i32] : memref<32x512xf32, #tpu.memory_space<vmem>> -> memref<32x128xf32, #tpu.memory_space<vmem>>
        %53 = tpu.memref_slice %arg9[%c2_i32] : memref<3x!tpu.dma_semaphore, #tpu.memory_space<semaphore_mem>> -> memref<1x!tpu.dma_semaphore, #tpu.memory_space<semaphore_mem>>
        %54 = tpu.memref_squeeze %53 : memref<1x!tpu.dma_semaphore, #tpu.memory_space<semaphore_mem>> -> memref<!tpu.dma_semaphore, #tpu.memory_space<semaphore_mem>>
        tpu.enqueue_dma source(%51 : memref<32x128xf32, #tpu.memory_space<any>>) target(%52 : memref<32x128xf32, #tpu.memory_space<vmem>>) target_semaphore(%54 : memref<!tpu.dma_semaphore, #tpu.memory_space<semaphore_mem>>)
        %c2_i32_38 = arith.constant 2 : i32
        %c0_i32_39 = arith.constant 0 : i32
        %55 = tpu.memref_slice %arg3[%arg0, %c0_i32_39, %49] : memref<2x32x256xf32, #tpu.memory_space<any>> -> memref<1x32x128xf32, #tpu.memory_space<any>>
        %56 = tpu.memref_squeeze %55 : memref<1x32x128xf32, #tpu.memory_space<any>> -> memref<32x128xf32, #tpu.memory_space<any>>
        %c0_i32_40 = arith.constant 0 : i32
        %c384_i32_41 = arith.constant 384 : i32
        %57 = tpu.memref_slice %arg7[%c0_i32_40, %c384_i32_41] : memref<32x512xf32, #tpu.memory_space<vmem>> -> memref<32x128xf32, #tpu.memory_space<vmem>>
        %58 = tpu.memref_slice %arg9[%c2_i32_38] : memref<3x!tpu.dma_semaphore, #tpu.memory_space<semaphore_mem>> -> memref<1x!tpu.dma_semaphore, #tpu.memory_space<semaphore_mem>>
        %59 = tpu.memref_squeeze %58 : memref<1x!tpu.dma_semaphore, #tpu.memory_space<semaphore_mem>> -> memref<!tpu.dma_semaphore, #tpu.memory_space<semaphore_mem>>
        tpu.wait_dma2 semaphore(%59 : memref<!tpu.dma_semaphore, #tpu.memory_space<semaphore_mem>>) src(%56 : memref<32x128xf32, #tpu.memory_space<any>>) dst(%57 : memref<32x128xf32, #tpu.memory_space<vmem>>)
      } else {
      }
      %c0_i32_27 = arith.constant 0 : i32
      %c0_i32_28 = arith.constant 0 : i32
      %40 = tpu.memref_slice %arg3[%arg0, %c0_i32_28, %22] : memref<2x32x256xf32, #tpu.memory_space<any>> -> memref<1x32x256xf32, #tpu.memory_space<any>>
      %41 = tpu.memref_squeeze %40 : memref<1x32x256xf32, #tpu.memory_space<any>> -> memref<32x256xf32, #tpu.memory_space<any>>
      %c0_i32_29 = arith.constant 0 : i32
      %c128_i32_30 = arith.constant 128 : i32
      %42 = tpu.memref_slice %arg7[%c0_i32_29, %c128_i32_30] : memref<32x512xf32, #tpu.memory_space<vmem>> -> memref<32x256xf32, #tpu.memory_space<vmem>>
      %43 = tpu.memref_slice %arg9[%c0_i32_27] : memref<3x!tpu.dma_semaphore, #tpu.memory_space<semaphore_mem>> -> memref<1x!tpu.dma_semaphore, #tpu.memory_space<semaphore_mem>>
      %44 = tpu.memref_squeeze %43 : memref<1x!tpu.dma_semaphore, #tpu.memory_space<semaphore_mem>> -> memref<!tpu.dma_semaphore, #tpu.memory_space<semaphore_mem>>
      tpu.wait_dma2 semaphore(%44 : memref<!tpu.dma_semaphore, #tpu.memory_space<semaphore_mem>>) src(%41 : memref<32x256xf32, #tpu.memory_space<any>>) dst(%42 : memref<32x256xf32, #tpu.memory_space<vmem>>)
      %c0_31 = arith.constant 0 : index
      %c0_32 = arith.constant 0 : index
      %45 = vector.load %arg7[%c0_31, %c0_32] : memref<32x512xf32, #tpu.memory_space<vmem>>, vector<32x512xf32>
      %46 = arith.truncf %45 : vector<32x512xf32> to vector<32x512xbf16>
      %c0_33 = arith.constant 0 : index
      %c0_34 = arith.constant 0 : index
      %47 = vector.load %arg8[%c0_33, %c0_34] : memref<32x512xbf16, #tpu.memory_space<vmem>>, vector<32x512xbf16>
      tpu.vector_store %arg8[%c0_33, %c0_34], %46 {strides = array<i32>} : memref<32x512xbf16, #tpu.memory_space<vmem>>, vector<32x512xbf16>,
    } else {
    }
    %c0 = arith.constant 0 : index
    %c64 = arith.constant 64 : index
    %3 = vector.load %arg8[%c0, %c64] : memref<32x512xbf16, #tpu.memory_space<vmem>>, vector<32x256xbf16>
    %c0_1 = arith.constant 0 : index
    %c80 = arith.constant 80 : index
    %4 = vector.load %arg8[%c0_1, %c80] : memref<32x512xbf16, #tpu.memory_space<vmem>>, vector<32x256xbf16>
    %c0_2 = arith.constant 0 : index
    %c96 = arith.constant 96 : index
    %5 = vector.load %arg8[%c0_2, %c96] : memref<32x512xbf16, #tpu.memory_space<vmem>>, vector<32x256xbf16>
    %c0_3 = arith.constant 0 : index
    %c112 = arith.constant 112 : index
    %6 = vector.load %arg8[%c0_3, %c112] : memref<32x512xbf16, #tpu.memory_space<vmem>>, vector<32x256xbf16>
    %c0_4 = arith.constant 0 : index
    %c128 = arith.constant 128 : index
    %7 = vector.load %arg8[%c0_4, %c128] : memref<32x512xbf16, #tpu.memory_space<vmem>>, vector<32x256xbf16>
    %c0_5 = arith.constant 0 : index
    %c144 = arith.constant 144 : index
    %8 = vector.load %arg8[%c0_5, %c144] : memref<32x512xbf16, #tpu.memory_space<vmem>>, vector<32x256xbf16>
    %c0_6 = arith.constant 0 : index
    %c160 = arith.constant 160 : index
    %9 = vector.load %arg8[%c0_6, %c160] : memref<32x512xbf16, #tpu.memory_space<vmem>>, vector<32x256xbf16>
    %c0_7 = arith.constant 0 : index
    %c176 = arith.constant 176 : index
    %10 = vector.load %arg8[%c0_7, %c176] : memref<32x512xbf16, #tpu.memory_space<vmem>>, vector<32x256xbf16>
    %c0_8 = arith.constant 0 : index
    %c192 = arith.constant 192 : index
    %11 = vector.load %arg8[%c0_8, %c192] : memref<32x512xbf16, #tpu.memory_space<vmem>>, vector<32x256xbf16>
    %12 = tpu.concatenate %3, %4, %5, %6, %7, %8, %9, %10, %11 in 0 : vector<32x256xbf16>, vector<32x256xbf16>, vector<32x256xbf16>, vector<32x256xbf16>, vector<32x256xbf16>, vector<32x256xbf16>, vector<32x256xbf16>, vector<32x256xbf16>, vector<32x256xbf16> -> vector<288x256xbf16>
    %c0_9 = arith.constant 0 : index
    %c0_10 = arith.constant 0 : index
    %13 = vector.load %arg4[%c0_9, %c0_10] : memref<64x288xbf16, #tpu.memory_space<vmem>>, vector<64x288xbf16>
    %cst = arith.constant dense<0.000000e+00> : vector<64x256xf32>
    %14 = tpu.matmul %13, %12, %cst {dimension_numbers = #tpu.dot_dimension_numbers<[1], [0], [0], [1], [0, 0, 1, 1], [], []>} : vector<64x288xbf16>, vector<288x256xbf16>, vector<64x256xf32> -> vector<64x256xf32>
    %c0_11 = arith.constant 0 : index
    %c0_12 = arith.constant 0 : index
    %15 = vector.load %arg5[%c0_11, %c0_12] : memref<64x1xf32, #tpu.memory_space<vmem>>, vector<64x1xf32>
    %16 = vector.broadcast %15 : vector<64x1xf32> to vector<64x256xf32>
    %17 = arith.addf %14, %16 : vector<64x256xf32>
    %c0_13 = arith.constant 0 : index
    %c0_14 = arith.constant 0 : index
    %c0_15 = arith.constant 0 : index
    %18 = vector.load %arg6[%c0_13, %c0_14, %c0_15] : memref<1x64x256xf32, #tpu.memory_space<vmem>>, vector<1x64x256xf32>
    %19 = vector.shape_cast %18 : vector<1x64x256xf32> to vector<64x256xf32>
    %20 = vector.shape_cast %17 : vector<64x256xf32> to vector<1x64x256xf32>
    tpu.vector_store %arg6[%c0_13, %c0_14, %c0_15], %20 {strides = array<i32>} : memref<1x64x256xf32, #tpu.memory_space<vmem>>, vector<1x64x256xf32>,
    return
  }
  func.func @transform_1(%arg0: i32, %arg1: i32, %arg2: i32) -> (i32, i32) {
    %c0_i32 = arith.constant 0 : i32
    %c0_i32_0 = arith.constant 0 : i32
    return %arg2, %c0_i32 : i32, i32
  }
  func.func @transform_2(%arg0: i32, %arg1: i32, %arg2: i32) -> (i32, i32) {
    %c0_i32 = arith.constant 0 : i32
    %c0_i32_0 = arith.constant 0 : i32
    return %arg2, %c0_i32 : i32, i32
  }
  func.func @transform_3(%arg0: i32, %arg1: i32, %arg2: i32) -> (i32, i32, i32) {
    %c0_i32 = arith.constant 0 : i32
    return %arg0, %arg2, %arg1 : i32, i32, i32
  }
}

</mosaic_0001>

<bundles_post_ra>
// kernel: tpu_custom_call.1
= control target key start
LH: loop header
LB: loop body
LE: loop exit
PB: predicated region body
PF: predicated region fallthrough
CT: control target
= control target key end

     0   :  { %8 = vsyncpa [#allocation6], 0  ;;  %s1815_s0 = inlined_call_operand.hbm [shape: f32[2,32,256], index: 0, kind: input, shape index: {}]   ;;  %s1816_s1 = inlined_call_operand.hbm [shape: bf16[64,288], index: 1, kind: input, shape index: {}]   ;;  %s1817_s2 = inlined_call_operand.vmem [shape: f32[64,1], index: 2, kind: input, shape index: {}]   ;;  %s1818_s3 = inlined_call_operand.hbm [shape: f32[2,64,256], index: 3, kind: output, shape index: {}]  }
   0x1   :  { %9 = vsyncpa [#allocation7], 0 }
   0x2   :  { %11 = vsyncpa [#allocation7 + $0x1], 0  ;;  %s1405_s12 = smov 0   ;;  %s1407_s13 = smov 0  }
   0x3   :  { %s1409_s14 = smov 0   ;;  %s1411_s15 = smov 0  }
   0x4   :  { %s1413_s16 = smov 0   ;;  %s1415_s17 = smov 0  }
   0x5 LB: > { %s1060_s18 = sadd.s32 4294967295, %s1366_s17   ;;  %s1061_s19 = sadd.s32 4294967294, %s1366_s17   ;;  %s1366_s17 = sphi %s1415_s17, %s17_s17   ;;  %s1362_s16 = sphi %s1413_s16, %s1836_s16   ;;  %s1358_s15 = sphi %s1411_s15, %s1835_s15   ;;  %s1354_s14 = sphi %s1409_s14, %s1834_s14   ;;  %s1350_s13 = sphi %s1407_s13, %s1833_s13   ;;  %s1346_s12 = sphi %s1405_s12, %s1832_s12  }
   0x6   : > { %s36_s20 = sadd.s32 1, %s1362_s16  ;;  %s99_s21 = sadd.s32 1, %s1354_s14 }
   0x7   : > { %p38_p0 = scmp.ge.s32.totalorder %s36_s20, 2  ;;  %p109_p1 = scmp.ne.s32.totalorder %s1354_s14, %s1350_s13 }
   0x8   : > { %p110_p2 = scmp.eq.s32.totalorder %s1060_s18, 1  ;;  %p115_p3 = scmp.ne.s32.totalorder %s1350_s13, %s1346_s12 }
   0x9   : > { %s1838_s20 = smov (%p38_p0, %s36_s20), 0  ;;  %p116_p5 = scmp.eq.s32.totalorder %s1061_s19, 1 }
   0xa   : > { %p1445_p4 = por %p110_p2, %p109_p1  ;;  %s92_s23 = ssub.s32 %s1362_s16, %s1838_s20 }
   0xb   : > { %p1062_p6 = scmp.ge.s32.totalorder %s1366_s17, 1  ;;  %p97_p7 = scmp.eq.s32.totalorder %s92_s23, 0 }
   0xc   : > { %s1823_s22 = scalar_select %p1445_p4, 1, 0 }
   0xd   : > { %p1452_p8 = por %p116_p5, %p115_p3  ;;  %p123_p9 = scmp.lt.s32.totalorder %s1366_s17, 3 }
   0xe   : > { %s1458_s25 = scalar_select %p97_p7, %s1354_s14, %s99_s21  }
   0xf   : > { %s1824_s24 = scalar_select %p1452_p8, 1, 0 }
  0x10   : > { %p1460_p10 = pnand %p1062_p6, %p123_p9  ;;  %p1464_p11 = scmp.eq.s32.totalorder %s1060_s18, 0 }
  0x11   : > { %s1368_s28 = smov [#allocation5]   ;;  %s1230_s6 = scalar_lea.hbm %s1816_s1, 1536 }
  0x12   : > { %s1825_s26 = scalar_select %p1460_p10, 1, 0 }
  0x13   : > { %s1826_s27 = scalar_select %p1464_p11, 1, 0 }
  0x14   : > { %p1138_p12 = pneg %p1460_p10  ;;  %s139_s29 = sshll.u32 %s1368_s28, 4  ;;  %s140_s29 = int_to_ptr.vmem [resolvable:$true] %s139_s29 }
  0x15   : > { %p1231_p0 = scmp.ne.s32.totalorder %s1816_s1, %s1230_s6  ;;  %p1237_p5 = scmp.lt.u32.totalorder %s1230_s6, %s1816_s1 }
  0x16   : > { %p1472_p13 = pnand %p1464_p11, %p1138_p12 }
  0x18   : > { %p1232_p1 = pneg %p1472_p13 }
  0x1a   : > { %p1233_p2 = pnand %p1232_p1, %p1231_p0 }
  0x1c   : > { %p1234_p3 = pneg %p1233_p2 }
  0x1e   : > { %p1239_p6 = pnand %p1237_p5, %p1234_p3 }
  0x20   : > { %1242 = shalt.err (!%p1239_p6)
}
  0x21   : > { %s1243_s11 = scalar_lea.vmem %s140_s29, 1536  ;;  %p1251_p8 = scmp.lt.s32.totalorder %s140_s29, %s140_s29 }
  0x22   : > { %p1244_p7 = scmp.ne.s32.totalorder %s140_s29, %s1243_s11  ;;  %p1252_p4 = scmp.lt.s32.totalorder %s1243_s11, %s1243_s11 }
  0x24   : > { %p1246_p9 = pnand %p1244_p7, %p1232_p1  ;;  %p1253_p11 = por %p1252_p4, %p1251_p8 }
  0x26   : > { %p1247_p12 = pneg %p1246_p9 }
  0x28   : > { %p1254_p10 = pnand %p1253_p11, %p1247_p12 }
  0x2a   : > { %1257 = shalt.err (!%p1254_p10)
}
  0x2b   : > { %s1369_s18 = smov 192   ;;  %s1370_s19 = smov 12  }
  0x2c   : > { %1141 = dma.hbm_to_vmem [thread:$0]  (!%p1472_p13), %s1816_s1, 1536, %s140_s29, [#allocation6], %s1369_s18, %s1369_s18, %s1370_s19  }
  0x2d   : > { %p1828_p0 = scmp.ne.s32.totalorder %s1825_s26, 0 }
  0x2e   : > { %p1829_p2 = scmp.ne.s32.totalorder (!%p1828_p0), %s1826_s27, 0 }
  0x2f   : > { %164 = sbr.rel (%p1828_p0) target bundleno = 698 (0x2ba), region = 28 }
  0x36   : > { %1335 = dma.done.wait (%p1829_p2), [#allocation6], 1536  }
  0x37   : > { %1337 = vsyncadd (%p1829_p2), [#allocation6], 4294965760  ;;  %s183_s28 = sand.u32 1, %s1350_s13   ;;  %s1096_s4 = sshll.u32 %s1358_s15, 10  ;;  %vm217_vm0 = vcmask 1048064   ;;  %vm245_vm1 = vcmask 523264  }
  0x38   : > { %s1502_s30 = sshll.u32 %s183_s28, 7  ;;  %s1507_s29 = scalar_lea.hbm %s1815_s0, %s1096_s4 }
  0x39   : > { %s1371_s26 = smov [#allocation2 + $0x8]   ;;  %s1258_s7 = scalar_lea.hbm %s1507_s29, 1024 }
  0x3a   : > { %s209_s27 = sshll.u32 %s1371_s26, 4  ;;  %p1259_p4 = scmp.ne.s32.totalorder %s1507_s29, %s1258_s7  ;;  %s1509_s27 = int_to_ptr.vmem [resolvable:$true] %s209_s27 }
  0x3b   : > { %s1260_s10 = scalar_lea.hbm %s1815_s0, 2048  ;;  %p1261_p8 = scmp.lt.u32.totalorder %s1507_s29, %s1815_s0 }
  0x3c   : > { %p1262_p10 = scmp.lt.u32.totalorder %s1260_s10, %s1258_s7  ;;  %p1264_p13 = scmp.lt.u32.totalorder %s1258_s7, %s1507_s29 }
  0x3e   : > { %p1263_p11 = por %p1262_p10, %p1261_p8 }
  0x40   : > { %p1265_p1 = por %p1264_p13, %p1263_p11 }
  0x42   : > { %p1266_p3 = pnand %p1265_p1, %p1259_p4 }
  0x44   : > { %1269 = shalt.err (!%p1266_p3)  }
  0x45   : > { %s1270_s19 = scalar_lea.vmem %s1509_s27, 1024  ;;  %s1372_s21 = smov [#allocation2]  }
  0x46   : > { %p1271_p5 = scmp.ne.s32.totalorder %s1509_s27, %s1270_s19  ;;  %s1272_s23 = sshll.u32 %s1372_s21, 4  ;;  %s1273_s23 = int_to_ptr.vmem [resolvable:$false] %s1272_s23 }
  0x47   : > { %s1274_s4 = scalar_lea.vmem %s1273_s23, 2048  ;;  %p1275_p6 = scmp.lt.s32.totalorder %s1509_s27, %s1273_s23 }
  0x48   : > { %p1276_p7 = scmp.lt.s32.totalorder %s1274_s4, %s1270_s19 }
  0x4a   : > { %p1277_p9 = por %p1276_p7, %p1275_p6 }
  0x4c   : > { %p1278_p12 = pnand %p1277_p9, %p1271_p5 }
  0x4e   : > { %1281 = shalt.err (!%p1278_p12)  }
  0x4f   : > { %s1373_s5 = smov 256   ;;  %s1374_s6 = smov 512   ;;  %v1376_v0 = vmov 0.0  }
  0x50   : > { %s1375_s26 = smov 16   ;;  %s1537_s7 = scalar_lea.vmem [#allocation8], %s1502_s30 }
  0x51   : > { %212 = dma.hbm_to_vmem [thread:$0]  %s1507_s29, 1024, %s1509_s27, [#allocation4], %s1373_s5, %s1374_s6, %s1375_s26 }
  0x52   : > { %218 = vst.msk [vmem:[#allocation2] sm:$0xff] %vm217_vm0, %v1376_v0  ;;  %219 = vst.msk [vmem:[#allocation2 + $0x20] sm:$0xff] %vm217_vm0, %v1376_v0 }
  0x53   : > { %220 = vst.msk [vmem:[#allocation2 + $0x40] sm:$0xff] %vm217_vm0, %v1376_v0  ;;  %221 = vst.msk [vmem:[#allocation2 + $0x60] sm:$0xff] %vm217_vm0, %v1376_v0 }
  0x54   : > { %246 = vst.msk [vmem:[#allocation2 + $0x18] sm:$0xff] %vm245_vm1, %v1376_v0  ;;  %247 = vst.msk [vmem:[#allocation2 + $0x38] sm:$0xff] %vm245_vm1, %v1376_v0 }
  0x55   : > { %248 = vst.msk [vmem:[#allocation2 + $0x58] sm:$0xff] %vm245_vm1, %v1376_v0  ;;  %249 = vst.msk [vmem:[#allocation2 + $0x78] sm:$0xff] %vm245_vm1, %v1376_v0 }
  0x56   : > { %1338 = dma.done.wait [#allocation4], 1024 }
  0x57   : > { %1339 = vsyncadd [#allocation4], 4294966272  ;;  %v277_v1 = vld [vmem:[#allocation2 + $0x8] sm:$0xff]  ;;  %v278_v6 = vld [vmem:[#allocation2 + $0x10] sm:$0xff]  ;;  %s1377_s29 = smov 112   ;;  %s1378_s30 = smov 96  }
  0x58   : > { %v281_v2 = vld [vmem:[#allocation2 + $0x28] sm:$0xff]  ;;  %v282_v7 = vld [vmem:[#allocation2 + $0x30] sm:$0xff]  ;;  %s1379_s27 = smov 80   ;;  %s1380_s8 = smov 64   ;;  %vm338_vm2 = vcmask 916480   ;;  %vm355_vm3 = vcmask 785408  }
  0x59   : > { %v276_v3 = vld [vmem:[#allocation2] sm:$0xff]  ;;  %v1539_v4 = vpack.c.bf16 %v281_v2, %v277_v1  ;;  %v285_v9 = vld [vmem:[#allocation2 + $0x48] sm:$0xff]  ;;  %v1542_v11 = vpack.c.bf16 %v282_v7, %v278_v6  ;;  %v286_v13 = vld [vmem:[#allocation2 + $0x50] sm:$0xff]  ;;  %s1381_s9 = smov 48   ;;  %s1382_s10 = smov 32   ;;  %vm372_vm4 = vcmask 654336  }
  0x5a   : > { %v280_v5 = vld [vmem:[#allocation2 + $0x20] sm:$0xff]  ;;  %v289_v10 = vld [vmem:[#allocation2 + $0x68] sm:$0xff]  ;;  %v290_v14 = vld [vmem:[#allocation2 + $0x70] sm:$0xff]  ;;  %vm406_vm5 = vcmask 392192   ;;  %vm423_vm6 = vcmask 261120   ;;  %vm440_vm7 = vcmask 130048  }
  0x5b   : > { %v292_v8 = vpack.c.bf16 %v280_v5, %v276_v3  ;;  %328 = vrot.lane.b32.xlu0 %v1539_v4, %s1377_s29  ;;  %v1544_v12 = vpack.c.bf16 %v289_v10, %v285_v9  ;;  %v284_v15 = vld [vmem:[#allocation2 + $0x40] sm:$0xff]  ;;  %v1547_v17 = vpack.c.bf16 %v290_v14, %v286_v13  ;;  %v279_v19 = vld [vmem:[#allocation2 + $0x18] sm:$0xff]  ;;  %s1099_s21 = sshll.u32 %s1358_s15, 11  ;;  %s933_s23 = sshll.u32 %s1537_s7, 4  ;;  %s1760_s23 = int_to_ptr.vmem [resolvable:$true] %s933_s23 }
  0x5c   : > { %v288_v16 = vld [vmem:[#allocation2 + $0x60] sm:$0xff]  ;;  %v283_v20 = vld [vmem:[#allocation2 + $0x38] sm:$0xff]  ;;  %s1766_s15 = scalar_lea.sflag [#allocation7], %s183_s28  ;;  %p1830_p2 = scmp.ne.s32.totalorder %s1823_s22, 0 }
  0x5d   : > { %326 = vrot.lane.b32.xlu1 %v292_v8, %s1377_s29  ;;  %v296_v18 = vpack.c.bf16 %v288_v16, %v284_v15  ;;  %v1568_v21 = vpack.c.bf16 %v283_v20, %v279_v19  ;;  %v287_v22 = vld [vmem:[#allocation2 + $0x58] sm:$0xff] }
  0x5e   : > { %v291_v23 = vld [vmem:[#allocation2 + $0x78] sm:$0xff] }
  0x5f   : > { %330 = vrot.lane.b32.xlu0 %v1542_v11, %s1377_s29  ;;  %v1573_v24 = vpack.c.bf16 %v291_v23, %v287_v22 }
  0x61   : > { %334 = vrot.lane.b32.xlu1 %v1544_v12, %s1377_s29 }
  0x63   : > { %336 = vrot.lane.b32.xlu0 %v1547_v17, %s1377_s29 }
  0x65   : > { %332 = vrot.lane.b32.xlu1 %v296_v18, %s1377_s29  ;;  %s1758_s29 = scalar_lea.hbm %s1818_s3, %s1099_s21 }
  0x67   : > { %345 = vrot.lane.b32.xlu0 %v1539_v4, %s1378_s30 }
  0x69   : > { %347 = vrot.lane.b32.xlu1 %v1542_v11, %s1378_s30 }
  0x6b   : > { %343 = vrot.lane.b32.xlu0 %v292_v8, %s1378_s30 }
  0x6d   : > { %351 = vrot.lane.b32.xlu1 %v1544_v12, %s1378_s30 }
  0x6f   : > { %353 = vrot.lane.b32.xlu0 %v1547_v17, %s1378_s30 }
  0x71   : > { %349 = vrot.lane.b32.xlu1 %v296_v18, %s1378_s30  ;;  %s1282_s30 = scalar_lea.vmem %s1760_s23, 2048 }
  0x72   : > { %p1283_p0 = scmp.ne.s32.totalorder %s1760_s23, %s1282_s30 }
  0x73   : > { %362 = vrot.lane.b32.xlu0 %v1539_v4, %s1379_s27 }
  0x74   : > { %p1284_p4 = pnand %p1283_p0, %p1830_p2 }
  0x75   : > { %364 = vrot.lane.b32.xlu1 %v1542_v11, %s1379_s27 }
  0x76   : > { %p1285_p8 = pneg %p1284_p4 }
  0x77   : > { %360 = vrot.lane.b32.xlu0 %v292_v8, %s1379_s27 }
  0x79   : > { %368 = vrot.lane.b32.xlu1 %v1544_v12, %s1379_s27 }
  0x7b   : > { %370 = vrot.lane.b32.xlu0 %v1547_v17, %s1379_s27 }
  0x7d   : > { %366 = vrot.lane.b32.xlu1 %v296_v18, %s1379_s27  ;;  %s1384_s27 = smov [#allocation8]  }
  0x7f   : > { %377 = vrot.lane.b32.xlu0 %v1539_v4, %s1380_s8 }
  0x81   : > { %379 = vrot.lane.b32.xlu1 %v1542_v11, %s1380_s8 }
  0x83   : > { %381 = vrot.lane.b32.xlu0 %v1544_v12, %s1380_s8 }
  0x85   : > { %383 = vrot.lane.b32.xlu1 %v1547_v17, %s1380_s8 }
  0x87   : > { %394 = vrot.lane.b32.xlu0 %v1539_v4, %s1381_s9 }
  0x89   : > { %396 = vrot.lane.b32.xlu1 %v1542_v11, %s1381_s9 }
  0x8b   : > { %398 = vrot.lane.b32.xlu0 %v1568_v21, %s1381_s9 }
  0x8d   : > { %400 = vrot.lane.b32.xlu1 %v1544_v12, %s1381_s9 }
  0x8f   : > { %402 = vrot.lane.b32.xlu0 %v1547_v17, %s1381_s9 }
  0x91   : > { %404 = vrot.lane.b32.xlu1 %v1573_v24, %s1381_s9 }
  0x93   : > { %411 = vrot.lane.b32.xlu0 %v1539_v4, %s1382_s10 }
  0x95   : > { %413 = vrot.lane.b32.xlu1 %v1542_v11, %s1382_s10 }
  0x97   : > { %415 = vrot.lane.b32.xlu0 %v1568_v21, %s1382_s10 }
  0x99   : > { %417 = vrot.lane.b32.xlu1 %v1544_v12, %s1382_s10 }
  0x9b   : > { %419 = vrot.lane.b32.xlu0 %v1547_v17, %s1382_s10 }
  0x9d   : > { %421 = vrot.lane.b32.xlu1 %v1573_v24, %s1382_s10 }
  0x9f   : > { %428 = vrot.lane.b32.xlu0 %v1539_v4, %s1375_s26 }
  0xa1   : > { %430 = vrot.lane.b32.xlu1 %v1542_v11, %s1375_s26 }
  0xa3   : > { %432 = vrot.lane.b32.xlu0 %v1568_v21, %s1375_s26 }
  0xa5   : > { %434 = vrot.lane.b32.xlu1 %v1544_v12, %s1375_s26 }
  0xa7   : > { %436 = vrot.lane.b32.xlu0 %v1547_v17, %s1375_s26 }
  0xa9   : > { %438 = vrot.lane.b32.xlu1 %v1573_v24, %s1375_s26 }
  0xab   : > { %569 = vrot.lane.b32.xlu0 %v292_v8, %s1380_s8 }
  0xad   : > { %571 = vrot.lane.b32.xlu1 %v296_v18, %s1380_s8 }
  0xcd   : > { %v329_v25 = vpop.permute.xlu0 %328 }
  0xcf   : > { %v327_v26 = vpop.permute.xlu1 %326 }
  0xd0   : > { %v339_v51 = vsel %vm338_vm2, %v327_v26, %v329_v25 }
  0xd1   : > { %v331_v27 = vpop.permute.xlu0 %330 }
  0xd2   : > { %577 = vrot.lane.b32.xlu1 %v331_v27, %s1380_s8  ;;  %v340_v47 = vsel %vm338_vm2, %v329_v25, %v331_v27 }
  0xd3   : > { %v335_v28 = vpop.permute.xlu1 %334 }
  0xd5   : > { %v337_v29 = vpop.permute.xlu0 %336 }
  0xd6   : > { %583 = vrot.lane.b32.xlu0 %v337_v29, %s1380_s8  ;;  %v342_v49 = vsel %vm338_vm2, %v335_v28, %v337_v29 }
  0xd7   : > { %v333_v30 = vpop.permute.xlu1 %332 }
  0xd8   : > { %v341_v53 = vsel %vm338_vm2, %v333_v30, %v335_v28 }
  0xd9   : > { %v346_v31 = vpop.permute.xlu0 %345 }
  0xdb   : > { %v348_v32 = vpop.permute.xlu1 %347 }
  0xdc   : > { %589 = vrot.lane.b32.xlu1 %v348_v32, %s1380_s8  ;;  %v357_v55 = vsel %vm355_vm3, %v346_v31, %v348_v32 }
  0xdd   : > { %v344_v33 = vpop.permute.xlu0 %343 }
  0xde   : > { %v356_v59 = vsel %vm355_vm3, %v344_v33, %v346_v31 }
  0xdf   : > { %v352_v34 = vpop.permute.xlu1 %351 }
  0xe1   : > { %v354_v35 = vpop.permute.xlu0 %353 }
  0xe2   : > { %595 = vrot.lane.b32.xlu0 %v354_v35, %s1380_s8  ;;  %v359_v57 = vsel %vm355_vm3, %v352_v34, %v354_v35  ;;  %v1216_v35 = vld [vmem:[#allocation5 + $0x4] ss:$12 sps:$4 sm:$0xff]  }
  0xe3   : > { %v350_v36 = vpop.permute.xlu1 %349  ;;  %784 = vmatprep.mubr.bf16.mxu1 %v1216_v35 }
  0xe4   : > { %v358_v61 = vsel %vm355_vm3, %v350_v36, %v352_v34 }
  0xe5   : > { %v363_v37 = vpop.permute.xlu0 %362 }
  0xe7   : > { %v365_v38 = vpop.permute.xlu1 %364 }
  0xe8   : > { %601 = vrot.lane.b32.xlu1 %v365_v38, %s1380_s8  ;;  %v374_v63 = vsel %vm372_vm4, %v363_v37, %v365_v38 }
  0xe9   : > { %v361_v39 = vpop.permute.xlu0 %360 }
  0xea   : > { %v373_v3 = vsel %vm372_vm4, %v361_v39, %v363_v37  ;;  %v1383_v37 = vmov 0   ;;  %v465_v39 = vld [vmem:[%s1817_s2 + $0x20] sm:$0xff] }
  0xeb   : > { %v369_v40 = vpop.permute.xlu1 %368  ;;  %857 = vmatprep.mubr.bf16.mxu0 %v1383_v37  ;;  %1213 = vset.pattern.permute.xlu1 %v1383_v37 }
  0xec   : > { %1212 = vset.pattern.permute.xlu0 %v1383_v37 }
  0xed   : > { %v371_v41 = vpop.permute.xlu0 %370 }
  0xee   : > { %607 = vrot.lane.b32.xlu0 %v371_v41, %s1380_s8  ;;  %v376_v1 = vsel %vm372_vm4, %v369_v40, %v371_v41 }
  0xef   : > { %v367_v42 = vpop.permute.xlu1 %366 }
  0xf0   : > { %v375_v6 = vsel %vm372_vm4, %v367_v42, %v369_v40  ;;  %v468_v42 = vld [vmem:[%s1817_s2 + $0x38] sm:$0xff] }
  0xf1   : > { %v1603_v43 = vpop.permute.xlu0 %377 }
  0xf2   : > { %609 = vrot.lane.b32.xlu0 %v1603_v43, %s1380_s8 }
  0xf3   : > { %v380_v44 = vpop.permute.xlu1 %379 }
  0xf4   : > { %613 = vrot.lane.b32.xlu1 %v380_v44, %s1380_s8  ;;  %v386_v45 = vsel %vm245_vm1, %v1603_v43, %v380_v44 }
  0xf5   : > { %752 = vmatprep.subr.bf16.mxu1 %v386_v45  ;;  %v1610_v46 = vpop.permute.xlu0 %381 }
  0xf6   : > { %575 = vrot.lane.b32.xlu0 %v340_v47, %s1380_s8 }
  0xf7   : > { %v384_v48 = vpop.permute.xlu1 %383 }
  0xf8   : > { %581 = vrot.lane.b32.xlu1 %v342_v49, %s1380_s8  ;;  %v387_v7 = vsel %vm245_vm1, %v1610_v46, %v384_v48 }
  0xf9   : > { %v395_v50 = vpop.permute.xlu0 %394 }
  0xfa   : > { %573 = vrot.lane.b32.xlu0 %v339_v51, %s1380_s8 }
  0xfb   : > { %v397_v52 = vpop.permute.xlu1 %396 }
  0xfc   : > { %579 = vrot.lane.b32.xlu1 %v341_v53, %s1380_s8  ;;  %v407_v16 = vsel %vm406_vm5, %v395_v50, %v397_v52 }
  0xfd   : > { %v399_v54 = vpop.permute.xlu0 %398 }
  0xfe   : > { %587 = vrot.lane.b32.xlu0 %v357_v55, %s1380_s8  ;;  %v408_v14 = vsel %vm406_vm5, %v397_v52, %v399_v54 }
  0xff   : > { %v401_v56 = vpop.permute.xlu1 %400 }
 0x100   : > { %593 = vrot.lane.b32.xlu1 %v359_v57, %s1380_s8 }
 0x101   : > { %v403_v58 = vpop.permute.xlu0 %402 }
 0x102   : > { %585 = vrot.lane.b32.xlu0 %v356_v59, %s1380_s8  ;;  %v409_v19 = vsel %vm406_vm5, %v401_v56, %v403_v58 }
 0x103   : > { %v405_v60 = vpop.permute.xlu1 %404 }
 0x104   : > { %591 = vrot.lane.b32.xlu1 %v358_v61, %s1380_s8  ;;  %v410_v25 = vsel %vm406_vm5, %v403_v58, %v405_v60 }
 0x105   : > { %v412_v62 = vpop.permute.xlu0 %411 }
 0x106   : > { %599 = vrot.lane.b32.xlu0 %v374_v63, %s1380_s8 }
 0x107   : > { %v414_v0 = vpop.permute.xlu1 %413 }
 0x108   : > { %605 = vrot.lane.b32.xlu1 %v376_v1, %s1380_s8  ;;  %v424_v29 = vsel %vm423_vm6, %v412_v62, %v414_v0 }
 0x109   : > { %v416_v2 = vpop.permute.xlu0 %415 }
 0x10a   : > { %597 = vrot.lane.b32.xlu0 %v373_v3, %s1380_s8  ;;  %v425_v28 = vsel %vm423_vm6, %v414_v0, %v416_v2 }
 0x10b   : > { %v418_v5 = vpop.permute.xlu1 %417 }
 0x10c   : > { %603 = vrot.lane.b32.xlu1 %v375_v6, %s1380_s8 }
 0x10d   : > { %v420_v8 = vpop.permute.xlu0 %419 }
 0x10e   : > { %611 = vrot.lane.b32.xlu0 %v386_v45, %s1380_s8  ;;  %v426_v31 = vsel %vm423_vm6, %v418_v5, %v420_v8 }
 0x10f   : > { %v422_v9 = vpop.permute.xlu1 %421 }
 0x110   : > { %617 = vrot.lane.b32.xlu1 %v387_v7, %s1380_s8  ;;  %v427_v32 = vsel %vm423_vm6, %v420_v8, %v422_v9 }
 0x111   : > { %v429_v10 = vpop.permute.xlu0 %428 }
 0x112   : > { %619 = vrot.lane.b32.xlu0 %v384_v48, %s1380_s8 }
 0x113   : > { %v431_v13 = vpop.permute.xlu1 %430 }
 0x114   : > { %615 = vrot.lane.b32.xlu1 %v1610_v46, %s1380_s8  ;;  %v441_v34 = vsel %vm440_vm7, %v429_v10, %v431_v13 }
 0x115   : > { %v433_v15 = vpop.permute.xlu0 %432 }
 0x116   : > { %623 = vrot.lane.b32.xlu0 %v407_v16, %s1380_s8  ;;  %v442_v33 = vsel %vm440_vm7, %v431_v13, %v433_v15 }
 0x117   : > { %v435_v18 = vpop.permute.xlu1 %434 }
 0x118   : > { %625 = vrot.lane.b32.xlu1 %v408_v14, %s1380_s8 }
 0x119   : > { %v437_v20 = vpop.permute.xlu0 %436 }
 0x11a   : > { %621 = vrot.lane.b32.xlu0 %v395_v50, %s1380_s8  ;;  %v443_v38 = vsel %vm440_vm7, %v435_v18, %v437_v20 }
 0x11b   : > { %v439_v22 = vpop.permute.xlu1 %438 }
 0x11c   : > { %629 = vrot.lane.b32.xlu1 %v409_v19, %s1380_s8  ;;  %v444_v36 = vsel %vm440_vm7, %v437_v20, %v439_v22 }
 0x11d   : > { %v570_v23 = vpop.permute.xlu0 %569 }
 0x11e   : > { %631 = vrot.lane.b32.xlu0 %v410_v25, %s1380_s8  ;;  %v669_v26 = vsel %vm245_vm1, %v570_v23, %v1603_v43  ;;  %v467_v43 = vld [vmem:[%s1817_s2 + $0x30] sm:$0xff] }
 0x11f   : > { %v572_v27 = vpop.permute.xlu1 %571  ;;  %753 = vmatpush1.bf16.msra.mxu1 %v669_v26 }
 0x120   : > { %627 = vrot.lane.b32.xlu1 %v401_v56, %s1380_s8  ;;  %754 = vmatprep.subr.bf16.mxu1 %v387_v7  ;;  %v670_v30 = vsel %vm245_vm1, %v572_v27, %v1610_v46 }
 0x122   : > { %635 = vrot.lane.b32.xlu0 %v424_v29, %s1380_s8 }
 0x123   : > { %755 = vmatpush1.bf16.msra.mxu1 %v670_v30 }
 0x124   : > { %637 = vrot.lane.b32.xlu1 %v425_v28, %s1380_s8 }
 0x126   : > { %633 = vrot.lane.b32.xlu0 %v412_v62, %s1380_s8 }
 0x128   : > { %641 = vrot.lane.b32.xlu1 %v426_v31, %s1380_s8 }
 0x12a   : > { %643 = vrot.lane.b32.xlu0 %v427_v32, %s1380_s8 }
 0x12c   : > { %639 = vrot.lane.b32.xlu1 %v418_v5, %s1380_s8 }
 0x12e   : > { %647 = vrot.lane.b32.xlu0 %v441_v34, %s1380_s8 }
 0x130   : > { %649 = vrot.lane.b32.xlu1 %v442_v33, %s1380_s8 }
 0x132   : > { %645 = vrot.lane.b32.xlu0 %v429_v10, %s1380_s8 }
 0x134   : > { %659 = vrot.lane.b32.xlu1 %v1542_v11, %s1380_s8  ;;  %v462_v11 = vld [vmem:[%s1817_s2 + $0x8] sm:$0xff] }
 0x136   : > { %661 = vrot.lane.b32.xlu0 %v1568_v21, %s1380_s8  ;;  %v463_v21 = vld [vmem:[%s1817_s2 + $0x10] sm:$0xff] }
 0x138   : > { %657 = vrot.lane.b32.xlu1 %v1539_v4, %s1380_s8  ;;  %v461_v4 = vld [vmem:[%s1817_s2] sm:$0xff] }
 0x13a   : > { %653 = vrot.lane.b32.xlu0 %v443_v38, %s1380_s8 }
 0x13c   : > { %655 = vrot.lane.b32.xlu1 %v444_v36, %s1380_s8 }
 0x13e   : > { %651 = vrot.lane.b32.xlu0 %v435_v18, %s1380_s8 }
 0x140   : > { %665 = vrot.lane.b32.xlu1 %v1547_v17, %s1380_s8  ;;  %v464_v17 = vld [vmem:[%s1817_s2 + $0x18] sm:$0xff] }
 0x142   : > { %667 = vrot.lane.b32.xlu0 %v1573_v24, %s1380_s8  ;;  %v466_v24 = vld [vmem:[%s1817_s2 + $0x28] sm:$0xff] }
 0x144   : > { %663 = vrot.lane.b32.xlu1 %v1544_v12, %s1380_s8  ;;  %v578_v40 = vpop.permute.xlu1 %577  ;;  %s1286_s8 = sshll.u32 %s1384_s27, 4  ;;  %s1287_s8 = int_to_ptr.vmem [resolvable:$false] %s1286_s8 }
 0x145   : > { %s1288_s9 = scalar_lea.vmem %s1287_s8, 4096  ;;  %p1289_p10 = scmp.lt.s32.totalorder %s1760_s23, %s1287_s8 }
 0x146   : > { %471 = vperm.xlu0 %1212, %v461_v4   ;;  %p1290_p11 = scmp.lt.s32.totalorder %s1288_s9, %s1282_s30 }
 0x148   : > { %476 = vperm.xlu1 %1213, %v462_v11   ;;  %v584_v12 = vpop.permute.xlu0 %583  ;;  %p1291_p13 = por %p1290_p11, %p1289_p10 }
 0x14a   : > { %486 = vperm.xlu0 %1212, %v464_v17   ;;  %p1292_p1 = pnand %p1291_p13, %p1285_p8 }
 0x14c   : > { %481 = vperm.xlu1 %1213, %v463_v21  }
 0x14e   : > { %496 = vperm.xlu0 %1212, %v466_v24   ;;  %v590_v44 = vpop.permute.xlu1 %589 }
 0x150   : > { %491 = vperm.xlu1 %1213, %v465_v39  }
 0x152   : > { %506 = vperm.xlu0 %1212, %v468_v42  }
 0x154   : > { %v596_v41 = vpop.permute.xlu0 %595  ;;  %501 = vperm.xlu1 %1213, %v467_v43  }
 0x15a   : > { %v602_v46 = vpop.permute.xlu1 %601 }
 0x160   : > { %v608_v45 = vpop.permute.xlu0 %607 }
 0x164   : > { %v610_v47 = vpop.permute.xlu0 %609 }
 0x166   : > { %v614_v48 = vpop.permute.xlu1 %613 }
 0x168   : > { %v576_v49 = vpop.permute.xlu0 %575 }
 0x169   : > { %v672_v51 = vsel %vm245_vm1, %v576_v49, %v578_v40 }
 0x16a   : > { %v582_v50 = vpop.permute.xlu1 %581  ;;  %756 = vmatprep.subr.bf16.mxu1 %v672_v51 }
 0x16b   : > { %v674_v55 = vsel %vm245_vm1, %v582_v50, %v584_v12 }
 0x16c   : > { %v574_v52 = vpop.permute.xlu0 %573 }
 0x16d   : > { %v671_v53 = vsel %vm245_vm1, %v574_v52, %v576_v49 }
 0x16e   : > { %v580_v54 = vpop.permute.xlu1 %579  ;;  %757 = vmatpush1.bf16.msra.mxu1 %v671_v53 }
 0x16f   : > { %758 = vmatprep.subr.bf16.mxu1 %v674_v55  ;;  %v673_v57 = vsel %vm245_vm1, %v580_v54, %v582_v50  ;;  %v1214_v54 = vld [vmem:[#allocation5] ss:$12 sps:$4 sm:$0xff]   ;;  %v1218_v55 = vld [vmem:[#allocation5 + $0x1c] ss:$12 sps:$4 sm:$0xff]  }
 0x170   : > { %v588_v56 = vpop.permute.xlu0 %587 }
 0x171   : > { %v676_v59 = vsel %vm245_vm1, %v588_v56, %v590_v44 }
 0x172   : > { %v594_v58 = vpop.permute.xlu1 %593  ;;  %759 = vmatpush1.bf16.msra.mxu1 %v673_v57 }
 0x173   : > { %760 = vmatprep.subr.bf16.mxu1 %v676_v59  ;;  %v678_v63 = vsel %vm245_vm1, %v594_v58, %v596_v41 }
 0x174   : > { %v586_v60 = vpop.permute.xlu0 %585 }
 0x175   : > { %v675_v61 = vsel %vm245_vm1, %v586_v60, %v588_v56  ;;  %v1217_v60 = vld [vmem:[#allocation5 + $0x8] ss:$12 sps:$4 sm:$0xff]  }
 0x176   : > { %v592_v62 = vpop.permute.xlu1 %591  ;;  %761 = vmatpush1.bf16.msra.mxu1 %v675_v61  ;;  %v1220_v61 = vld [vmem:[#allocation5 + $0x18] ss:$12 sps:$4 sm:$0xff]  }
 0x177   : > { %762 = vmatprep.subr.bf16.mxu1 %v678_v63  ;;  %v677_v1 = vsel %vm245_vm1, %v592_v62, %v594_v58  ;;  %v1222_v62 = vld [vmem:[#allocation5 + $0x34] ss:$12 sps:$4 sm:$0xff]  }
 0x178   : > { %v600_v0 = vpop.permute.xlu0 %599  ;;  %v1221_v63 = vld [vmem:[#allocation5 + $0x20] ss:$12 sps:$4 sm:$0xff]  }
 0x179   : > { %v680_v3 = vsel %vm245_vm1, %v600_v0, %v602_v46 }
 0x17a   : > { %v606_v2 = vpop.permute.xlu1 %605  ;;  %763 = vmatpush1.bf16.msra.mxu1 %v677_v1  ;;  %v1226_v1 = vld [vmem:[#allocation5 + $0x4c] ss:$12 sps:$4 sm:$0xff]  }
 0x17b   : > { %764 = vmatprep.subr.bf16.mxu1 %v680_v3  ;;  %v682_v8 = vsel %vm245_vm1, %v606_v2, %v608_v45  ;;  %v1228_v3 = vld [vmem:[#allocation5 + $0x48] ss:$12 sps:$4 sm:$0xff]  }
 0x17c   : > { %v598_v5 = vpop.permute.xlu0 %597 }
 0x17d   : > { %v679_v6 = vsel %vm245_vm1, %v598_v5, %v600_v0  ;;  %v1224_v0 = vld [vmem:[#allocation5 + $0x30] ss:$12 sps:$4 sm:$0xff]  }
 0x17e   : > { %v604_v7 = vpop.permute.xlu1 %603  ;;  %765 = vmatpush1.bf16.msra.mxu1 %v679_v6  ;;  %v1229_v5 = vld [vmem:[#allocation5 + $0x50] ss:$12 sps:$4 sm:$0xff]  }
 0x17f   : > { %766 = vmatprep.subr.bf16.mxu1 %v682_v8  ;;  %v681_v10 = vsel %vm245_vm1, %v604_v7, %v606_v2  ;;  %v1225_v2 = vld [vmem:[#allocation5 + $0x38] ss:$12 sps:$4 sm:$0xff]  }
 0x180   : > { %v612_v9 = vpop.permute.xlu0 %611 }
 0x181   : > { %v684_v14 = vsel %vm245_vm1, %v612_v9, %v614_v48  ;;  %v683_v19 = vsel %vm245_vm1, %v610_v47, %v612_v9 }
 0x182   : > { %v618_v13 = vpop.permute.xlu1 %617  ;;  %767 = vmatpush1.bf16.msra.mxu1 %v681_v10 }
 0x183   : > { %768 = vmatprep.subr.bf16.mxu1 %v684_v14 }
 0x184   : > { %v620_v15 = vpop.permute.xlu0 %619 }
 0x185   : > { %v686_v16 = vsel %vm245_vm1, %v618_v13, %v620_v15 }
 0x186   : > { %v616_v18 = vpop.permute.xlu1 %615  ;;  %769 = vmatpush1.bf16.msra.mxu1 %v683_v19 }
 0x187   : > { %770 = vmatprep.subr.bf16.mxu1 %v686_v16  ;;  %v685_v22 = vsel %vm245_vm1, %v616_v18, %v618_v13 }
 0x188   : > { %v624_v20 = vpop.permute.xlu0 %623 }
 0x18a   : > { %v626_v23 = vpop.permute.xlu1 %625  ;;  %771 = vmatpush1.bf16.msra.mxu1 %v685_v22 }
 0x18b   : > { %v688_v25 = vsel %vm245_vm1, %v624_v20, %v626_v23 }
 0x18c   : > { %772 = vmatprep.subr.bf16.mxu1 %v688_v25  ;;  %v622_v26 = vpop.permute.xlu0 %621 }
 0x18d   : > { %v687_v27 = vsel %vm245_vm1, %v622_v26, %v624_v20 }
 0x18e   : > { %v630_v28 = vpop.permute.xlu1 %629  ;;  %773 = vmatpush1.bf16.msra.mxu1 %v687_v27 }
 0x190   : > { %v632_v29 = vpop.permute.xlu0 %631 }
 0x191   : > { %v690_v30 = vsel %vm245_vm1, %v630_v28, %v632_v29 }
 0x192   : > { %v628_v31 = vpop.permute.xlu1 %627  ;;  %774 = vmatprep.subr.bf16.mxu1 %v690_v30 }
 0x193   : > { %v689_v32 = vsel %vm245_vm1, %v628_v31, %v630_v28 }
 0x194   : > { %775 = vmatpush1.bf16.msra.mxu1 %v689_v32  ;;  %v636_v33 = vpop.permute.xlu0 %635 }
 0x196   : > { %v638_v34 = vpop.permute.xlu1 %637 }
 0x197   : > { %v692_v35 = vsel %vm245_vm1, %v636_v33, %v638_v34 }
 0x198   : > { %776 = vmatprep.subr.bf16.mxu1 %v692_v35  ;;  %v634_v36 = vpop.permute.xlu0 %633 }
 0x199   : > { %v691_v38 = vsel %vm245_vm1, %v634_v36, %v636_v33 }
 0x19a   : > { %v642_v4 = vpop.permute.xlu1 %641  ;;  %777 = vmatpush1.bf16.msra.mxu1 %v691_v38 }
 0x19c   : > { %v644_v11 = vpop.permute.xlu0 %643 }
 0x19d   : > { %v694_v17 = vsel %vm245_vm1, %v642_v4, %v644_v11 }
 0x19e   : > { %v640_v21 = vpop.permute.xlu1 %639  ;;  %778 = vmatprep.subr.bf16.mxu1 %v694_v17 }
 0x19f   : > { %v693_v12 = vsel %vm245_vm1, %v640_v21, %v642_v4 }
 0x1a0   : > { %779 = vmatpush1.bf16.msra.mxu1 %v693_v12  ;;  %v648_v24 = vpop.permute.xlu0 %647 }
 0x1a2   : > { %v650_v39 = vpop.permute.xlu1 %649 }
 0x1a3   : > { %v696_v40 = vsel %vm245_vm1, %v648_v24, %v650_v39 }
 0x1a4   : > { %780 = vmatprep.subr.bf16.mxu1 %v696_v40  ;;  %v646_v41 = vpop.permute.xlu0 %645 }
 0x1a5   : > { %v695_v42 = vsel %vm245_vm1, %v646_v41, %v648_v24 }
 0x1a6   : > { %v660_v43 = vpop.permute.xlu1 %659  ;;  %781 = vmatpush1.bf16.msra.mxu1 %v695_v42 }
 0x1a8   : > { %v662_v44 = vpop.permute.xlu0 %661 }
 0x1a9   : > { %v700_v46 = vsel %vm245_vm1, %v660_v43, %v662_v44 }
 0x1aa   : > { %v658_v45 = vpop.permute.xlu1 %657  ;;  %825 = vmatprep.subr.bf16.mxu0 %v700_v46 }
 0x1ab   : > { %v699_v47 = vsel %vm245_vm1, %v658_v45, %v660_v43 }
 0x1ac   : > { %826 = vmatpush1.bf16.msra.mxu0 %v699_v47  ;;  %v654_v48 = vpop.permute.xlu0 %653 }
 0x1ae   : > { %v656_v49 = vpop.permute.xlu1 %655 }
 0x1af   : > { %v698_v50 = vsel %vm245_vm1, %v654_v48, %v656_v49 }
 0x1b0   : > { %782 = vmatprep.subr.bf16.mxu1 %v698_v50  ;;  %v652_v51 = vpop.permute.xlu0 %651 }
 0x1b1   : > { %v697_v52 = vsel %vm245_vm1, %v652_v51, %v654_v48 }
 0x1b2   : > { %v666_v53 = vpop.permute.xlu1 %665  ;;  %783 = vmatpush1.bf16.msra.mxu1 %v697_v52 }
 0x1b4   : > { %v668_v56 = vpop.permute.xlu0 %667 }
 0x1b5   : > { %v702_v57 = vsel %vm245_vm1, %v666_v53, %v668_v56  ;;  %785 = vmatmul.mubr.bf16.vlgmr.msra.gmra.mrb[0].mxu1 %v1214_v54 }
 0x1b6   : > { %v664_v58 = vpop.permute.xlu1 %663  ;;  %827 = vmatprep.subr.bf16.mxu0 %v702_v57  ;;  %794 = vmatprep.mubr.bf16.mxu1 %v1218_v55 }
 0x1b7   : > { %v701_v59 = vsel %vm245_vm1, %v664_v58, %v666_v53 }
 0x1b8   : > { %828 = vmatpush1.bf16.msra.mxu0 %v701_v59 }
 0x1bb   : > { %1084 = vmatmul.mubr.msk.bf16.vlgmr.msra.gmra.mrb[0].mxu0 %vm423_vm6, %v1217_v60 }
 0x1bc   : > { %867 = vmatprep.mubr.bf16.mxu0 %v1383_v37 }
 0x1bd   : > { %795 = vmatmul.mubr.bf16.gmra.mrb[4].mxu1 %v1220_v61 }
 0x1be   : > { %804 = vmatprep.mubr.bf16.mxu1 %v1222_v62 }
 0x1c3   : > { %1085 = vmatmul.mubr.msk.bf16.gmra.mrb[4].mxu0 %vm423_vm6, %v1221_v63 }
 0x1c4   : > { %877 = vmatprep.mubr.bf16.mxu0 %v1383_v37 }
 0x1c5   : > { %805 = vmatmul.mubr.bf16.gmra.mrb[8].mxu1 %v1224_v0  ;;  %v472_v6 = vpop.permute.xlu0 %471 }
 0x1c6   : > { %814 = vmatprep.mubr.bf16.mxu1 %v1226_v1 }
 0x1c7   : > { %v477_v15 = vpop.permute.xlu1 %476 }
 0x1c9   : > { %v487_v33 = vpop.permute.xlu0 %486 }
 0x1cb   : > { %1086 = vmatmul.mubr.msk.bf16.gmra.mrb[8].mxu0 %vm423_vm6, %v1225_v2  ;;  %v482_v25 = vpop.permute.xlu1 %481 }
 0x1cc   : > { %887 = vmatprep.mubr.bf16.mxu0 %v1383_v37 }
 0x1cd   : > { %815 = vmatmul.mubr.bf16.gmra.mrb[12].mxu1 %v1228_v3  ;;  %v497_v47 = vpop.permute.xlu0 %496 }
 0x1cf   : > { %v492_v41 = vpop.permute.xlu1 %491 }
 0x1d1   : > { %v507_v1 = vpop.permute.xlu0 %506 }
 0x1d3   : > { %1087 = vmatmul.mubr.msk.bf16.gmra.mrb[12].mxu0 %vm423_vm6, %v1229_v5  ;;  %v502_v62 = vpop.permute.xlu1 %501 }
 0x288   : > { %v786_v7 = vpop.f32.mrb[0].mxu1 }
 0x289   : > { %v788_v8 = vpop.f32.mrb[1].mxu1  ;;  %v787_v10 = vadd.f32 %v786_v7, %v472_v6 }
 0x28a   : > { %v790_v9 = vpop.f32.mrb[2].mxu1  ;;  %v789_v13 = vadd.f32 %v788_v8, %v472_v6 }
 0x28b   : > { %v792_v14 = vpop.f32.mrb[3].mxu1  ;;  %v791_v18 = vadd.f32 %v790_v9, %v477_v15 }
 0x28c   : > { %v793_v20 = vadd.f32 %v792_v14, %v477_v15 }
 0x28e   : > { %v859_v16 = vpop.f32.mrb[0].mxu0 }
 0x28f   : > { %v860_v19 = vadd.f32 %v859_v16, %v787_v10  ;;  %v861_v37 = vpop.f32.mrb[1].mxu0 }
 0x290   : > { %v862_v22 = vadd.f32 %v861_v37, %v789_v13  ;;  %v863_v23 = vpop.f32.mrb[2].mxu0  ;;  %v796_v27 = vpop.f32.mrb[4].mxu1 }
 0x291   : > { %898 = vst [vmem:[%s1537_s7] sm:$0xff] %v860_v19  ;;  %v864_v26 = vadd.f32 %v863_v23, %v791_v18  ;;  %v865_v28 = vpop.f32.mrb[3].mxu0  ;;  %v798_v30 = vpop.f32.mrb[5].mxu1  ;;  %v797_v32 = vadd.f32 %v796_v27, %v482_v25 }
 0x292   : > { %899 = vst [vmem:[%s1537_s7 + $0x8] sm:$0xff] %v862_v22  ;;  %v866_v29 = vadd.f32 %v865_v28, %v793_v20  ;;  %v800_v31 = vpop.f32.mrb[6].mxu1  ;;  %v799_v34 = vadd.f32 %v798_v30, %v482_v25 }
 0x293   : > { %900 = vst [vmem:[%s1537_s7 + $0x10] sm:$0xff] %v864_v26  ;;  %v802_v35 = vpop.f32.mrb[7].mxu1  ;;  %v801_v38 = vadd.f32 %v800_v31, %v487_v33 }
 0x294   : > { %901 = vst [vmem:[%s1537_s7 + $0x18] sm:$0xff] %v866_v29  ;;  %v803_v17 = vadd.f32 %v802_v35, %v487_v33 }
 0x296   : > { %v869_v36 = vpop.f32.mrb[4].mxu0 }
 0x297   : > { %v870_v4 = vadd.f32 %v869_v36, %v797_v32  ;;  %v871_v11 = vpop.f32.mrb[5].mxu0 }
 0x298   : > { %v872_v21 = vadd.f32 %v871_v11, %v799_v34  ;;  %v873_v12 = vpop.f32.mrb[6].mxu0  ;;  %v806_v39 = vpop.f32.mrb[8].mxu1 }
 0x299   : > { %902 = vst [vmem:[%s1537_s7 + $0x20] sm:$0xff] %v870_v4  ;;  %v874_v24 = vadd.f32 %v873_v12, %v801_v38  ;;  %v875_v40 = vpop.f32.mrb[7].mxu0  ;;  %v808_v43 = vpop.f32.mrb[9].mxu1  ;;  %v807_v44 = vadd.f32 %v806_v39, %v492_v41 }
 0x29a   : > { %903 = vst [vmem:[%s1537_s7 + $0x28] sm:$0xff] %v872_v21  ;;  %v876_v42 = vadd.f32 %v875_v40, %v803_v17  ;;  %v810_v45 = vpop.f32.mrb[10].mxu1  ;;  %v809_v48 = vadd.f32 %v808_v43, %v492_v41 }
 0x29b   : > { %904 = vst [vmem:[%s1537_s7 + $0x30] sm:$0xff] %v874_v24  ;;  %v812_v46 = vpop.f32.mrb[11].mxu1  ;;  %v811_v50 = vadd.f32 %v810_v45, %v497_v47 }
 0x29c   : > { %905 = vst [vmem:[%s1537_s7 + $0x38] sm:$0xff] %v876_v42  ;;  %v813_v53 = vadd.f32 %v812_v46, %v497_v47 }
 0x29e   : > { %v879_v49 = vpop.f32.mrb[8].mxu0 }
 0x29f   : > { %v880_v51 = vadd.f32 %v879_v49, %v807_v44  ;;  %v881_v52 = vpop.f32.mrb[9].mxu0 }
 0x2a0   : > { %v882_v54 = vadd.f32 %v881_v52, %v809_v48  ;;  %v883_v55 = vpop.f32.mrb[10].mxu0  ;;  %v816_v57 = vpop.f32.mrb[12].mxu1 }
 0x2a1   : > { %906 = vst [vmem:[%s1537_s7 + $0x40] sm:$0xff] %v880_v51  ;;  %v884_v56 = vadd.f32 %v883_v55, %v811_v50  ;;  %v885_v58 = vpop.f32.mrb[11].mxu0  ;;  %v818_v60 = vpop.f32.mrb[13].mxu1  ;;  %v817_v0 = vadd.f32 %v816_v57, %v502_v62 }
 0x2a2   : > { %907 = vst [vmem:[%s1537_s7 + $0x48] sm:$0xff] %v882_v54  ;;  %v886_v59 = vadd.f32 %v885_v58, %v813_v53  ;;  %v820_v61 = vpop.f32.mrb[14].mxu1  ;;  %v819_v2 = vadd.f32 %v818_v60, %v502_v62 }
 0x2a3   : > { %908 = vst [vmem:[%s1537_s7 + $0x50] sm:$0xff] %v884_v56  ;;  %v822_v63 = vpop.f32.mrb[15].mxu1  ;;  %v821_v5 = vadd.f32 %v820_v61, %v507_v1 }
 0x2a4   : > { %909 = vst [vmem:[%s1537_s7 + $0x58] sm:$0xff] %v886_v59  ;;  %v823_v8 = vadd.f32 %v822_v63, %v507_v1 }
 0x2a6   : > { %v889_v3 = vpop.f32.mrb[12].mxu0 }
 0x2a7   : > { %v890_v6 = vadd.f32 %v889_v3, %v817_v0  ;;  %v891_v7 = vpop.f32.mrb[13].mxu0 }
 0x2a8   : > { %v892_v9 = vadd.f32 %v891_v7, %v819_v2  ;;  %v893_v10 = vpop.f32.mrb[14].mxu0 }
 0x2a9   : > { %910 = vst [vmem:[%s1537_s7 + $0x60] sm:$0xff] %v890_v6  ;;  %v894_v13 = vadd.f32 %v893_v10, %v821_v5  ;;  %v895_v14 = vpop.f32.mrb[15].mxu0 }
 0x2aa   : > { %911 = vst [vmem:[%s1537_s7 + $0x68] sm:$0xff] %v892_v9  ;;  %v896_v15 = vadd.f32 %v895_v14, %v823_v8 }
 0x2ab   : > { %912 = vst [vmem:[%s1537_s7 + $0x70] sm:$0xff] %v894_v13 }
 0x2ac   : > { %913 = vst [vmem:[%s1537_s7 + $0x78] sm:$0xff] %v896_v15 }
 0x2ad   : > { %1295 = shalt.err (!%p1292_p1)
}
 0x2ae   : > { %s1296_s28 = scalar_lea.hbm %s1758_s29, 2048  ;;  %s1300_s11 = scalar_lea.hbm %s1818_s3, 4096 }
 0x2af   : > { %p1297_p3 = scmp.ne.s32.totalorder %s1758_s29, %s1296_s28  ;;  %p1301_p7 = scmp.lt.u32.totalorder %s1758_s29, %s1818_s3 }
 0x2b0   : > { %p1302_p9 = scmp.lt.u32.totalorder %s1300_s11, %s1296_s28  ;;  %p1304_p0 = scmp.lt.u32.totalorder %s1296_s28, %s1758_s29 }
 0x2b1   : > { %p1298_p5 = pnand %p1297_p3, %p1830_p2 }
 0x2b2   : > { %p1303_p12 = por %p1302_p9, %p1301_p7 }
 0x2b3   : > { %p1299_p6 = pneg %p1298_p5 }
 0x2b4   : > { %p1305_p4 = por %p1304_p0, %p1303_p12 }
 0x2b6   : > { %p1306_p8 = pnand %p1305_p4, %p1299_p6 }
 0x2b8   : > { %1309 = shalt.err (!%p1306_p8)
}
 0x2b9   : > { %1136 = dma.vmem_to_hbm [thread:$0]  (%p1830_p2), %s1760_s23, 2048, %s1758_s29, %s1766_s15, %s1373_s5, %s1373_s5, %s1375_s26  }
 0x2ba PF: > { %p1148_p10 = scmp.ge.s32.totalorder %s1366_s17, 2  ;;  %s948_s21 = sand.u32 1, %s1346_s12  }
 0x2bb   : > { %p1831_p11 = scmp.ne.s32.totalorder %s1824_s24, 0  ;;  %s949_s4 = scalar_lea.sflag [#allocation7], %s948_s21 }
 0x2bd   : > { %p1143_p13 = pnand %p1148_p10, %p1831_p11 }
 0x2bf   : > { %1341 = dma.done.wait (!%p1143_p13), %s949_s4, 2048  }
 0x2c0   : > { %1343 = vsyncadd (!%p1143_p13), %s949_s4, 4294965248  ;;  %s17_s17 = sadd.s32 1, %s1366_s17   ;;  %s1832_s12 = smov %s1350_s13 }
 0x2c1   : > { %p14_p1 = scmp.ge.s32.totalorder %s17_s17, 4   ;;  %s1833_s13 = smov %s1354_s14 }
 0x2c2   : > { %s1834_s14 = smov %s1458_s25  ;;  %s1835_s15 = smov %s1362_s16 }
 0x2c3   : > { %s1836_s16 = smov %s1838_s20  ;;  %16 = sbr.rel (!%p14_p1) target bundleno = 5 (0x5), region = 98 }
 0x2ca   :  { %954 = vsyncpa [#allocation6], 1 }
 0x2cb   :  { %956 = vsyncpa [#allocation6 + $0x1], 1 }
 0x2cc   :  { %957 = vsyncpa [#allocation7], 1 }
 0x2cd   :  { %959 = vsyncpa [#allocation7 + $0x1], 1 }
 0x2ce   :  { %960 = vsyncmov [#allocation4] }
 0x2d1   :  { %s961_s22 = vpop.sfrf %960 }
 0x2d2   :  { %p1093_p2 = scmp.ne.s32.totalorder %s961_s22, 0 }
 0x2d4   :  { %965 = shalt.err (%p1093_p2)  }
 0x2d5   :  { %967 = vsyncmov [#allocation4 + $0x1] }
 0x2d8   :  { %s968_s24 = vpop.sfrf %967 }
 0x2d9   :  { %p1094_p3 = scmp.ne.s32.totalorder %s968_s24, 0 }
 0x2db   :  { %972 = shalt.err (%p1094_p3)  }
 0x2dc   :  { %974 = vsyncmov [#allocation4 + $0x2] }
 0x2df   :  { %s975_s25 = vpop.sfrf %974 }
 0x2e0   :  { %p1095_p5 = scmp.ne.s32.totalorder %s975_s25, 0 }
 0x2e2   :  { %979 = shalt.err (%p1095_p5)  }

</bundles_post_ra>
